<compile_context>
chip_gen: v6e
topology: v6e:2x2x1
jax: 0.10.0
libtpu: 0.0.40
codegen_flags: <defaults>
</compile_context>

<pallas_src>
import jax
import jax.numpy as jnp
import numpy as np
from jax.experimental import pallas as pl
from jax.experimental.pallas import tpu as pltpu


def _sae_kernel(x_ref, w_enc_ref, b_enc_ref, w_dec_ref, b_dec_ref, thr_ref,
                out_ref, acc_ref):
    s = pl.program_id(1)

    # Initialize the reconstruction accumulator with the decoder bias once per
    # batch tile (the d_sae reduction axis streams over s).
    @pl.when(s == 0)
    def _():
        acc_ref[...] = jnp.broadcast_to(b_dec_ref[...], acc_ref.shape)

    # Encode chunk: x @ W_enc[:, chunk] + b_enc_eff[chunk].
    # (the b_dec pre-subtraction is folded into b_enc_eff by the wrapper)
    pre = jnp.dot(x_ref[...], w_enc_ref[...],
                  preferred_element_type=jnp.float32) + b_enc_ref[...]

    # Fused ReLU + JumpReLU threshold gate. Equivalent to
    # relu(pre) * (relu(pre) > thr) because thr >= 0 on the inference path.
    thr = thr_ref[0]
    acts = jnp.where(pre > thr, pre, 0.0)

    # Decode chunk accumulate: acc += acts @ W_dec[chunk, :]   (f32 accumulate)
    acc_ref[...] += jnp.dot(acts.astype(w_dec_ref.dtype), w_dec_ref[...],
                            preferred_element_type=jnp.float32)

    @pl.when(s == pl.num_programs(1) - 1)
    def _():
        out_ref[...] = acc_ref[...].astype(out_ref.dtype)

    # TODO(synk): the use_threshold=False batch top-k + scatter training path
    # has no clean single-kernel Pallas equivalent here; forward() uses the
    # threshold (inference) path.


def _largest_divisor_leq(n, cap):
    t = min(n, cap)
    while n % t:
        t -= 1
    return t


def _vmem_limit_bytes(tb, ts, d_in, x_bytes, w_bytes, out_bytes):
    need = (2 * tb * d_in * x_bytes        # x tile (double-buffered)
            + 2 * d_in * ts * w_bytes      # W_enc chunk
            + 2 * ts * 4                   # b_enc chunk (f32)
            + 2 * ts * d_in * w_bytes      # W_dec chunk
            + 2 * d_in * 4                 # b_dec row
            + 2 * tb * d_in * out_bytes    # output tile
            + tb * d_in * 4)               # f32 accumulator scratch
    return min(max(need + (8 << 20), 32 << 20), 112 << 20)


def batch_topk_sae_forward(x, w_enc, b_enc, w_dec, b_dec, threshold,
                           *, tb=None, ts=None, compute_dtype=jnp.bfloat16):
    """x: (B, d_in) or (B, L, d_in). Returns reconstruction with x's shape."""
    orig_shape = x.shape
    if x.ndim == 3:
        x = x.reshape(-1, orig_shape[-1])
    B, d_in = x.shape
    d_sae = w_enc.shape[1]

    if tb is None:
        tb = _largest_divisor_leq(B, 256)       # MXU-aligned batch tile
    if ts is None:
        ts = _largest_divisor_leq(d_sae, 2048)  # d_sae streaming chunk
    assert B % tb == 0 and d_sae % ts == 0

    # Fold the b_dec pre-subtraction into the encoder bias (done once, f32):
    #   (x - b_dec) @ W_enc + b_enc == x @ W_enc + (b_enc - b_dec @ W_enc)
    b_enc_eff = (b_enc.astype(jnp.float32)
                 - b_dec.astype(jnp.float32) @ w_enc.astype(jnp.float32))
    b_enc_eff = b_enc_eff.reshape(1, d_sae)
    b_dec2 = b_dec.astype(jnp.float32).reshape(1, d_in)
    # Module contract: threshold must be >= 0 on the inference path; the fused
    # relu+threshold select in the kernel relies on it.
    thr = jnp.asarray(threshold, jnp.float32).reshape(1)

    xc = x.astype(compute_dtype)
    wec = w_enc.astype(compute_dtype)
    wdc = w_dec.astype(compute_dtype)

    w_bytes = jnp.dtype(compute_dtype).itemsize
    x_bytes = jnp.dtype(compute_dtype).itemsize
    out_bytes = jnp.dtype(x.dtype).itemsize

    grid = (B // tb, d_sae // ts)
    out = pl.pallas_call(
        _sae_kernel,
        out_shape=jax.ShapeDtypeStruct((B, d_in), x.dtype),
        grid_spec=pltpu.PrefetchScalarGridSpec(
            num_scalar_prefetch=0,
            grid=grid,
            in_specs=[
                pl.BlockSpec((tb, d_in), lambda i, s: (i, 0)),    # x tile
                pl.BlockSpec((d_in, ts), lambda i, s: (0, s)),    # W_enc chunk
                pl.BlockSpec((1, ts), lambda i, s: (0, s)),       # b_enc chunk
                pl.BlockSpec((ts, d_in), lambda i, s: (s, 0)),    # W_dec chunk
                pl.BlockSpec((1, d_in), lambda i, s: (0, 0)),     # b_dec
                pl.BlockSpec(memory_space=pltpu.MemorySpace.SMEM),  # threshold
            ],
            out_specs=pl.BlockSpec((tb, d_in), lambda i, s: (i, 0)),
            scratch_shapes=[pltpu.VMEM((tb, d_in), jnp.float32)],
        ),
        compiler_params=pltpu.CompilerParams(
            dimension_semantics=("parallel", "arbitrary"),
            vmem_limit_bytes=_vmem_limit_bytes(tb, ts, d_in,
                                               x_bytes, w_bytes, out_bytes)),
    )(xc, wec, b_enc_eff, wdc, b_dec2, thr)

    return out.reshape(orig_shape)


def _reference_exact(x, w_enc, b_enc, w_dec, b_dec, threshold):
    """Original PyTorch module semantics, full f32."""
    acts = jax.nn.relu((x - b_dec[None, :]) @ w_enc + b_enc[None, :])
    acts = acts * (acts > threshold).astype(acts.dtype)
    return acts @ w_dec + b_dec[None, :]


def _reference_matched(x, w_enc, b_enc, w_dec, b_dec, threshold, compute_dtype):
    """Same math as the kernel (bias fold, fused gate, bf16 inputs, f32 acc)."""
    xc = x.astype(compute_dtype)
    wec = w_enc.astype(compute_dtype)
    wdc = w_dec.astype(compute_dtype)
    b_enc_eff = (b_enc.astype(jnp.float32)
                 - b_dec.astype(jnp.float32) @ w_enc.astype(jnp.float32))
    pre = jnp.dot(xc, wec, preferred_element_type=jnp.float32) + b_enc_eff
    acts = jnp.where(pre > threshold, pre, 0.0)
    recon = jnp.dot(acts.astype(compute_dtype), wdc,
                    preferred_element_type=jnp.float32) + b_dec.astype(jnp.float32)
    return recon.astype(x.dtype)


if __name__ == "__main__":
    # Small synthetic shapes consistent with the module's forward; tiles chosen
    # so both grid axes (batch tile + d_sae streaming chunk) are exercised.
    B, d_in, d_sae = 16, 128, 512
    k = 4  # unused on the threshold path, kept for interface parity

    key = jax.random.PRNGKey(0)
    kx, ke, kd, kbe, kbd = jax.random.split(key, 5)

    x = jax.random.normal(kx, (B, d_in), jnp.float32)
    w_enc = jax.random.normal(ke, (d_in, d_sae), jnp.float32) * 0.1
    w_dec = jax.random.normal(kd, (d_sae, d_in), jnp.float32)
    # normalize decoder rows (matches check_decoder_norms expectation)
    w_dec = w_dec / jnp.linalg.norm(w_dec, axis=1, keepdims=True)
    b_enc = jax.random.normal(kbe, (d_sae,), jnp.float32) * 0.01
    b_dec = jax.random.normal(kbd, (d_in,), jnp.float32) * 0.01
    threshold = jnp.float32(0.1)  # must be >= 0 for the inference path

    out = batch_topk_sae_forward(x, w_enc, b_enc, w_dec, b_dec, threshold,
                                 tb=8, ts=128)
    out = jax.block_until_ready(out)

    # 1) Exact-math check against a JAX reference using the identical
    #    precision/fold/gate (only accumulation order differs).
    ref_matched = _reference_matched(x, w_enc, b_enc, w_dec, b_dec, threshold,
                                     jnp.bfloat16)
    np.testing.assert_allclose(np.asarray(out), np.asarray(ref_matched),
                               rtol=1e-3, atol=1e-3)

    # 2) Loose sanity check against the original full-f32 module semantics
    #    (difference is just bf16 weight/activation rounding).
    ref_exact = _reference_exact(x, w_enc, b_enc, w_dec, b_dec, threshold)
    np.testing.assert_allclose(np.asarray(out), np.asarray(ref_exact),
                               rtol=1e-1, atol=1e-1)

    print("KERNEL_OK")
</pallas_src>

<mosaic_0001>
module attributes {stable_mosaic.version = 11 : i64} {
  func.func @_sae_kernel(%arg0: i32, %arg1: i32, %arg2: memref<8x128xbf16, #tpu.memory_space<vmem>>, %arg3: memref<128x128xbf16, #tpu.memory_space<vmem>>, %arg4: memref<1x128xf32, #tpu.memory_space<vmem>>, %arg5: memref<128x128xbf16, #tpu.memory_space<vmem>>, %arg6: memref<1x128xf32, #tpu.memory_space<vmem>>, %arg7: memref<1xf32, #tpu.memory_space<smem>>, %arg8: memref<8x128xf32, #tpu.memory_space<vmem>>, %arg9: memref<8x128xf32, #tpu.memory_space<vmem>>) attributes {dimension_semantics = [#tpu.dimension_semantics<parallel>, #tpu.dimension_semantics<arbitrary>], iteration_bounds = array<i64: 2, 4>, scalar_prefetch = 0 : i64, scratch_operands = 1 : i64, tpu.core_type = #tpu.core_type<tc>, window_params = [{transform_indices = @transform_0, window_bounds = array<i64: 8, 128>}, {transform_indices = @transform_1, window_bounds = array<i64: 128, 128>}, {transform_indices = @transform_2, window_bounds = array<i64: 1, 128>}, {transform_indices = @transform_3, window_bounds = array<i64: 128, 128>}, {pipeline_mode = #tpu.pipeline_mode<synchronous>, transform_indices = @transform_4, window_bounds = array<i64: 1, 128>}, {transform_indices = @transform_5, window_bounds = array<i64: 1>}, {transform_indices = @transform_6, window_bounds = array<i64: 8, 128>}]} {
    %c0_i32 = arith.constant 0 : i32
    %0 = arith.cmpi eq, %arg1, %c0_i32 : i32
    %1 = arith.extui %0 : i1 to i32
    %c0_i32_0 = arith.constant 0 : i32
    %2 = arith.cmpi ne, %1, %c0_i32_0 : i32
    scf.if %2 {
      %c0_16 = arith.constant 0 : index
      %c0_17 = arith.constant 0 : index
      %23 = vector.load %arg6[%c0_16, %c0_17] : memref<1x128xf32, #tpu.memory_space<vmem>>, vector<1x128xf32>
      %24 = vector.shape_cast %23 : vector<1x128xf32> to vector<1x128xf32>
      %25 = vector.broadcast %24 : vector<1x128xf32> to vector<8x128xf32>
      %c0_18 = arith.constant 0 : index
      %c0_19 = arith.constant 0 : index
      %26 = vector.load %arg9[%c0_18, %c0_19] : memref<8x128xf32, #tpu.memory_space<vmem>>, vector<8x128xf32>
      tpu.vector_store %arg9[%c0_18, %c0_19], %25 {strides = array<i32>} : memref<8x128xf32, #tpu.memory_space<vmem>>, vector<8x128xf32>,
    } else {
    }
    %c0 = arith.constant 0 : index
    %c0_1 = arith.constant 0 : index
    %3 = vector.load %arg2[%c0, %c0_1] : memref<8x128xbf16, #tpu.memory_space<vmem>>, vector<8x128xbf16>
    %c0_2 = arith.constant 0 : index
    %c0_3 = arith.constant 0 : index
    %4 = vector.load %arg3[%c0_2, %c0_3] : memref<128x128xbf16, #tpu.memory_space<vmem>>, vector<128x128xbf16>
    %cst = arith.constant dense<0.000000e+00> : vector<8x128xf32>
    %5 = tpu.matmul %3, %4, %cst {dimension_numbers = #tpu.dot_dimension_numbers<[1], [0], [0], [1], [0, 0, 1, 1], [], []>} : vector<8x128xbf16>, vector<128x128xbf16>, vector<8x128xf32> -> vector<8x128xf32>
    %c0_4 = arith.constant 0 : index
    %c0_5 = arith.constant 0 : index
    %6 = vector.load %arg4[%c0_4, %c0_5] : memref<1x128xf32, #tpu.memory_space<vmem>>, vector<1x128xf32>
    %7 = vector.broadcast %6 : vector<1x128xf32> to vector<8x128xf32>
    %8 = arith.addf %5, %7 : vector<8x128xf32>
    %c0_6 = arith.constant 0 : index
    %9 = memref.load %arg7[%c0_6] : memref<1xf32, #tpu.memory_space<smem>>
    %10 = vector.broadcast %9 : f32 to vector<8x128xf32>
    %11 = arith.cmpf ogt, %8, %10 : vector<8x128xf32>
    %cst_7 = arith.constant 0.000000e+00 : f32
    %12 = vector.broadcast %cst_7 : f32 to vector<8x128xf32>
    %13 = arith.select %11, %8, %12 : vector<8x128xi1>, vector<8x128xf32>
    %c0_8 = arith.constant 0 : index
    %c0_9 = arith.constant 0 : index
    %14 = vector.load %arg9[%c0_8, %c0_9] : memref<8x128xf32, #tpu.memory_space<vmem>>, vector<8x128xf32>
    %15 = arith.truncf %13 : vector<8x128xf32> to vector<8x128xbf16>
    %c0_10 = arith.constant 0 : index
    %c0_11 = arith.constant 0 : index
    %16 = vector.load %arg5[%c0_10, %c0_11] : memref<128x128xbf16, #tpu.memory_space<vmem>>, vector<128x128xbf16>
    %cst_12 = arith.constant dense<0.000000e+00> : vector<8x128xf32>
    %17 = tpu.matmul %15, %16, %cst_12 {dimension_numbers = #tpu.dot_dimension_numbers<[1], [0], [0], [1], [0, 0, 1, 1], [], []>} : vector<8x128xbf16>, vector<128x128xbf16>, vector<8x128xf32> -> vector<8x128xf32>
    %18 = arith.addf %14, %17 : vector<8x128xf32>
    %c0_13 = arith.constant 0 : index
    %c0_14 = arith.constant 0 : index
    %19 = vector.load %arg9[%c0_13, %c0_14] : memref<8x128xf32, #tpu.memory_space<vmem>>, vector<8x128xf32>
    tpu.vector_store %arg9[%c0_13, %c0_14], %18 {strides = array<i32>} : memref<8x128xf32, #tpu.memory_space<vmem>>, vector<8x128xf32>,
    %c3_i32 = arith.constant 3 : i32
    %20 = arith.cmpi eq, %arg1, %c3_i32 : i32
    %21 = arith.extui %20 : i1 to i32
    %c0_i32_15 = arith.constant 0 : i32
    %22 = arith.cmpi ne, %21, %c0_i32_15 : i32
    scf.if %22 {
      %c0_16 = arith.constant 0 : index
      %c0_17 = arith.constant 0 : index
      %23 = vector.load %arg9[%c0_16, %c0_17] : memref<8x128xf32, #tpu.memory_space<vmem>>, vector<8x128xf32>
      %c0_18 = arith.constant 0 : index
      %c0_19 = arith.constant 0 : index
      %24 = vector.load %arg8[%c0_18, %c0_19] : memref<8x128xf32, #tpu.memory_space<vmem>>, vector<8x128xf32>
      tpu.vector_store %arg8[%c0_18, %c0_19], %23 {strides = array<i32>} : memref<8x128xf32, #tpu.memory_space<vmem>>, vector<8x128xf32>,
    } else {
    }
    return
  }
  func.func @transform_0(%arg0: i32, %arg1: i32) -> (i32, i32) {
    %c0_i32 = arith.constant 0 : i32
    %c0_i32_0 = arith.constant 0 : i32
    return %arg0, %c0_i32 : i32, i32
  }
  func.func @transform_1(%arg0: i32, %arg1: i32) -> (i32, i32) {
    %c0_i32 = arith.constant 0 : i32
    %c0_i32_0 = arith.constant 0 : i32
    return %c0_i32, %arg1 : i32, i32
  }
  func.func @transform_2(%arg0: i32, %arg1: i32) -> (i32, i32) {
    %c0_i32 = arith.constant 0 : i32
    %c0_i32_0 = arith.constant 0 : i32
    return %c0_i32, %arg1 : i32, i32
  }
  func.func @transform_3(%arg0: i32, %arg1: i32) -> (i32, i32) {
    %c0_i32 = arith.constant 0 : i32
    %c0_i32_0 = arith.constant 0 : i32
    return %arg1, %c0_i32 : i32, i32
  }
  func.func @transform_4(%arg0: i32, %arg1: i32) -> (i32, i32) {
    %c0_i32 = arith.constant 0 : i32
    %c0_i32_0 = arith.constant 0 : i32
    %c0_i32_1 = arith.constant 0 : i32
    return %c0_i32, %c0_i32_0 : i32, i32
  }
  func.func @transform_5(%arg0: i32, %arg1: i32) -> i32 {
    %c0_i32 = arith.constant 0 : i32
    %c0_i32_0 = arith.constant 0 : i32
    return %c0_i32 : i32
  }
  func.func @transform_6(%arg0: i32, %arg1: i32) -> (i32, i32) {
    %c0_i32 = arith.constant 0 : i32
    %c0_i32_0 = arith.constant 0 : i32
    return %arg0, %c0_i32 : i32, i32
  }
}

</mosaic_0001>

<bundles_post_ra>
// kernel: tpu_custom_call.1
= control target key start
LH: loop header
LB: loop body
LE: loop exit
PB: predicated region body
PF: predicated region fallthrough
CT: control target
= control target key end

     0   :  { %s1562_s0 = inlined_call_operand.hbm [shape: bf16[16,128], index: 0, kind: input, shape index: {}]   ;;  %s1563_s1 = inlined_call_operand.hbm [shape: bf16[128,512], index: 1, kind: input, shape index: {}]   ;;  %s1564_s2 = inlined_call_operand.vmem [shape: f32[1,512], index: 2, kind: input, shape index: {}]   ;;  %s1565_s3 = inlined_call_operand.hbm [shape: bf16[512,128], index: 3, kind: input, shape index: {}]   ;;  %s1566_s4 = inlined_call_operand.vmem [shape: f32[1,128], index: 4, kind: input, shape index: {}]   ;;  %s1567_s5 = inlined_call_operand.<no memory space> [shape: f32[1], index: 5, kind: input, shape index: {}]   ;;  %s1568_s6 = inlined_call_operand.hbm [shape: f32[16,128], index: 6, kind: output, shape index: {}]  }
   0x1   :  { %1578 = sst [smem:[#allocation21_spill]] %s1562_s0 }
   0x2   :  { %1579 = sst [smem:[#allocation22_spill]] %s1563_s1 }
   0x3   :  { %1580 = sst [smem:[#allocation23_spill]] %s1564_s2 }
   0x4   :  { %1581 = sst [smem:[#allocation24_spill]] %s1566_s4 }
   0x5   :  { %1582 = sst [smem:[#allocation25_spill]] %s1568_s6 }
   0x6   :  { %11 = sst [smem:[#allocation3]] %s1567_s5 }
   0x7   :  { %12 = vsyncpa [#allocation5], 0 }
   0x8   :  { %14 = vsyncpa [#allocation5 + $0x1], 0 }
   0x9   :  { %15 = vsyncpa [#allocation8], 0 }
   0xa   :  { %17 = vsyncpa [#allocation8 + $0x1], 0 }
   0xb   :  { %18 = vsyncpa [#allocation6], 0 }
   0xc   :  { %20 = vsyncpa [#allocation6 + $0x1], 0  ;;  %s1253_s23 = smov 0   ;;  %s1255_s24 = smov 0  }
   0xd   :  { %s1257_s25 = smov 0   ;;  %s1259_s26 = smov 0  }
   0xe   :  { %s1261_s27 = smov 0   ;;  %s1263_s28 = smov 0  }
   0xf   :  { %s1265_s29 = smov 0   ;;  %s1267_s5 = smov 0  }
  0x10   :  { %s1269_s30 = smov 0   ;;  %s1271_s7 = smov 0  }
  0x11   :  { %s1273_s8 = smov 0  }
  0x12 LB: > { %1583 = sst [smem:[#allocation14_spill]] %s1184_s28  ;;  %p53_p0 = scmp.eq.s32.totalorder %s1204_s8, 0  ;;  %s1204_s8 = sphi %s1273_s8, %s26_s8   ;;  %s1200_s7 = sphi %s1271_s7, %s1616_s7   ;;  %s1196_s30 = sphi %s1269_s30, %s1623_s30   ;;  %s1192_s5 = sphi %s1267_s5, %s1614_s5   ;;  %s1188_s29 = sphi %s1265_s29, %s1622_s29   ;;  %s1184_s28 = sphi %s1263_s28, %s1613_s28   ;;  %s1180_s27 = sphi %s1261_s27, %s1621_s27   ;;  %s1176_s26 = sphi %s1259_s26, %s1620_s26   ;;  %s1172_s25 = sphi %s1257_s25, %s1619_s25   ;;  %s1168_s24 = sphi %s1255_s24, %s1618_s24   ;;  %s1164_s23 = sphi %s1253_s23, %s1617_s23  }
  0x13   : > { %1584 = sst [smem:[#allocation15_spill]] %s1192_s5  ;;  %p78_p1 = scmp.ne.s32.totalorder %s1172_s25, %s1168_s24 }
  0x14   : > { %1585 = sst [smem:[#allocation16_spill]] %s1200_s7  ;;  %p1574_p2 = scmp.lt.s32.totalorder %s1204_s8, 8 }
  0x15   : > { %s252_s10 = sand.u32 1, %s1204_s8   ;;  %p80_p3 = por %p78_p1, %p53_p0 }
  0x16   : > { %s254_s11 = sand.u32 1, %s1172_s25   ;;  %s768_s12 = sshll.u32 %s1196_s30, 6 }
  0x17   : > { %s1318_s13 = sshll.u32 %s254_s11, 6  ;;  %s1586_s1 = sld [smem:[#allocation22_spill]] }
  0x18   : > { %p1325_p4 = pnand %p1574_p2, %p80_p3  ;;  %s256_s18 = scalar_lea.vmem [#allocation7], %s1318_s13 }
  0x19   : > { %s262_s19 = sshll.u32 %s256_s18, 4  ;;  %s1330_s20 = scalar_lea.sflag [#allocation8], %s252_s10  ;;  %s263_s19 = int_to_ptr.vmem [resolvable:$true] %s262_s19 }
  0x1a   : > { %p1571_p5 = pneg %p1325_p4  ;;  %s1009_s21 = scalar_lea.vmem %s263_s19, 1024 }
  0x1b   : > { %p1010_p6 = scmp.ne.s32.totalorder %s263_s19, %s1009_s21  ;;  %s1206_s22 = smov [#allocation7]  }
  0x1c   : > { %s1014_s11 = sshll.u32 %s1206_s22, 4  ;;  %s1015_s11 = int_to_ptr.vmem [resolvable:$false] %s1014_s11 }
  0x1d   : > { %s261_s16 = scalar_lea.hbm %s1586_s1, %s768_s12  ;;  %p1012_p7 = pnand %p1010_p6, %p1571_p5 }
  0x1e   : > { %s1016_s12 = scalar_lea.vmem %s1015_s11, 2048  ;;  %p1017_p9 = scmp.lt.s32.totalorder %s263_s19, %s1015_s11 }
  0x1f   : > { %p1013_p8 = pneg %p1012_p7  ;;  %p1018_p10 = scmp.lt.s32.totalorder %s1016_s12, %s1009_s21 }
  0x21   : > { %p1019_p11 = por %p1018_p10, %p1017_p9 }
  0x23   : > { %p1020_p12 = pnand %p1019_p11, %p1013_p8 }
  0x25   : > { %1023 = shalt.err (!%p1020_p12)
}
  0x26   : > { %s1207_s14 = smov 256   ;;  %s1569_s10 = smov 64  }
  0x27   : > { %s1570_s15 = smov 4   ;;  %p772_p13 = scmp.ge.s32.totalorder %s1204_s8, 1 }
  0x28   : > { %877 = dma.hbm_to_vmem [thread:$0]  (!%p1325_p4), %s261_s16, 1024, %s263_s19, %s1330_s20, %s1207_s14, %s1569_s10, %s1570_s15  }
  0x29   : > { %p297_p1 = scmp.lt.s32.totalorder %s1204_s8, 9  ;;  %s1349_s21 = sadd.s32 4294967295, %s1204_s8  }
  0x2a   : > { %s762_s22 = sadd.s32 4294967294, %s1204_s8   ;;  %s35_s11 = sadd.s32 1, %s1196_s30 }
  0x2b   : > { %p1344_p3 = pnand %p772_p13, %p297_p1  ;;  %p36_p6 = scmp.ge.s32.totalorder %s35_s11, 4 }
  0x2c   : > { %s38_s12 = sadd.s32 1, %s1200_s7  ;;  %s45_s16 = sadd.s32 1, %s1184_s28 }
  0x2d   : > { %p52_p7 = scmp.ne.s32.totalorder %s1184_s28, %s1180_s27  ;;  %s1625_s11 = smov (%p36_p6, %s35_s11), 0 }
  0x2e   : > { %1589 = sst [smem:[#allocation17_spill]] %s1625_s11  ;;  %s1627_s12 = smov (!%p36_p6, %s38_s12), %s1200_s7 }
  0x2f   : > { %p1365_p8 = por %p53_p0, %p52_p7  ;;  %p58_p9 = scmp.ne.s32.totalorder %s1180_s27, %s1176_s26 }
  0x30   : > { %p40_p10 = scmp.ge.s32.totalorder %s1627_s12, 2  ;;  %p59_p11 = scmp.eq.s32.totalorder %s1349_s21, 0 }
  0x31   : > { %s68_s14 = ssub.s32 %s1196_s30, %s1625_s11  ;;  %p84_p12 = scmp.ne.s32.totalorder %s1168_s24, %s1164_s23 }
  0x32   : > { %s1629_s12 = smov (%p40_p10, %s1627_s12), 0  ;;  %p1381_p13 = por %p59_p11, %p58_p9 }
  0x33   : > { %1591 = sst [smem:[#allocation18_spill]] %s1629_s12  ;;  %p69_p0 = scmp.eq.s32.totalorder %s68_s14, 0 }
  0x34   : > { %s42_s15 = ssub.s32 %s1200_s7, %s1629_s12  ;;  %p1387_p1 = por %p84_p12, %p59_p11 }
  0x35   : > { %p43_p6 = scmp.eq.s32.totalorder %s42_s15, 0  ;;  %p202_p5 = scmp.eq.s32.totalorder %s1349_s21, 7 }
  0x36   : > { %s1594_s1 = sadd.s32 1, %s1172_s25  ;;  %p208_p2 = scmp.eq.s32.totalorder %s762_s22, 7 }
  0x37   : > { %s1395_s23 = scalar_select %p69_p0, %s1172_s25, %s1594_s1  }
  0x38   : > { %s1398_s11 = scalar_select %p43_p6, %s1184_s28, %s45_s16  }
  0x39   : > { %1595 = sst [smem:[#allocation19_spill]] %s1395_s23  ;;  %p1403_p10 = por %p202_p5, %p52_p7 }
  0x3a   : > { %1596 = sst [smem:[#allocation20_spill]] %s1398_s11  ;;  %s234_s5 = sand.u32 1, %s1184_s28  }
  0x3b   : > { %s766_s14 = sshll.u32 %s1200_s7, 6  ;;  %p1412_p11 = por %p208_p2, %p58_p9 }
  0x3c   : > { %s765_s15 = sshll.u32 %s234_s5, 2  ;;  %s1599_s0 = sld [smem:[#allocation21_spill]] }
  0x3d   : > { %s1598_s12 = scalar_select %p1412_p11, 1, 0 }
  0x3e   : > { %p1600_p12 = scmp.lt.s32.totalorder %s1204_s8, 8  ;;  %s238_s22 = scalar_lea.vmem [#allocation4], %s765_s15 }
  0x3f   : > { %s245_s11 = sshll.u32 %s238_s22, 4  ;;  %s235_s7 = scalar_lea.sflag [#allocation5], %s234_s5  ;;  %s246_s11 = int_to_ptr.vmem [resolvable:$true] %s245_s11 }
  0x40   : > { %p1423_p0 = pnand %p1600_p12, %p1365_p8  ;;  %s1037_s28 = scalar_lea.vmem %s246_s11, 64 }
  0x41   : > { %p1038_p5 = scmp.ne.s32.totalorder %s246_s11, %s1037_s28  ;;  %s1210_s23 = smov [#allocation4]  }
  0x42   : > { %s243_s1 = scalar_lea.hbm %s1599_s0, %s766_s14  ;;  %p1026_p2 = pneg %p1423_p0 }
  0x43   : > { %s1042_s2 = sshll.u32 %s1210_s23, 4  ;;  %s1043_s2 = int_to_ptr.vmem [resolvable:$false] %s1042_s2 }
  0x44   : > { %p1040_p7 = pnand %p1038_p5, %p1026_p2  ;;  %s1044_s4 = scalar_lea.vmem %s1043_s2, 128 }
  0x45   : > { %p1045_p6 = scmp.lt.s32.totalorder %s246_s11, %s1043_s2  ;;  %p1046_p8 = scmp.lt.s32.totalorder %s1044_s4, %s1037_s28 }
  0x46   : > { %p1041_p9 = pneg %p1040_p7 }
  0x47   : > { %p1047_p12 = por %p1046_p8, %p1045_p6 }
  0x49   : > { %p1048_p11 = pnand %p1047_p12, %p1041_p9 }
  0x4b   : > { %1051 = shalt.err (!%p1048_p11)
}
  0x4c   : > { %874 = dma.hbm_to_vmem [thread:$0]  (!%p1423_p0), %s243_s1, 64, %s246_s11, %s235_s7  }
  0x4d   : > { %s804_s5 = sshll.u32 %s1196_s30, 10  ;;  %s282_s19 = scalar_lea.vmem [#allocation9], %s1318_s13 }
  0x4e   : > { %s289_s14 = sshll.u32 %s282_s19, 4  ;;  %s288_s23 = scalar_lea.hbm %s1565_s3, %s804_s5  ;;  %s290_s14 = int_to_ptr.vmem [resolvable:$true] %s289_s14 }
  0x4f   : > { %s1065_s0 = scalar_lea.vmem %s290_s14, 1024  ;;  %p1602_p5 = pneg %p1325_p4 }
  0x50   : > { %p1066_p2 = scmp.ne.s32.totalorder %s290_s14, %s1065_s0  ;;  %s1211_s28 = smov [#allocation9]  }
  0x51   : > { %s1070_s16 = sshll.u32 %s1211_s28, 4  ;;  %s1071_s16 = int_to_ptr.vmem [resolvable:$false] %s1070_s16 }
  0x52   : > { %p1068_p7 = pnand %p1066_p2, %p1602_p5  ;;  %s1072_s2 = scalar_lea.vmem %s1071_s16, 2048 }
  0x53   : > { %p1073_p9 = scmp.lt.s32.totalorder %s290_s14, %s1071_s16  ;;  %p1074_p0 = scmp.lt.s32.totalorder %s1072_s2, %s1065_s0 }
  0x54   : > { %p1069_p11 = pneg %p1068_p7 }
  0x55   : > { %p1075_p6 = por %p1074_p0, %p1073_p9 }
  0x57   : > { %p1076_p8 = pnand %p1075_p6, %p1069_p11 }
  0x59   : > { %1079 = shalt.err (!%p1076_p8)
}
  0x5a   : > { %s1603_s7 = smov 4   ;;  %s1604_s13 = smov 64  }
  0x5b   : > { %880 = dma.hbm_to_vmem [thread:$0]  (!%p1325_p4), %s288_s23, 1024, %s290_s14, %s1330_s20, %s1604_s13, %s1604_s13, %s1603_s7  }
  0x5c   : > { %301 = sbr.rel (%p1344_p3) target bundleno = 572 (0x23c), region = 44  ;;  %s1448_s11 = sand.u32 (!%p1344_p3), 1, %s1180_s27  }
  0x5d   : > { %s773_s0 = sshll.u32 (!%p1344_p3), %s1448_s11, 2  ;;  %s304_s1 = scalar_lea.sflag (!%p1344_p3), [#allocation5], %s1448_s11 }
  0x5e   : > { %s1452_s4 = scalar_lea.vmem (!%p1344_p3), [#allocation4], %s773_s0 }
  0x61   : > { %1151 = dma.done.wait (%p1381_p13), %s304_s1, 64  }
  0x62   : > { %1153 = vsyncadd (%p1381_p13), %s304_s1, 4294967232  ;;  %s312_s17 = sand.u32 1, %s1349_s21   ;;  %s314_s20 = sand.u32 1, %s1168_s24  }
  0x63   : > { %s774_s18 = sshll.u32 %s314_s20, 6  ;;  %s313_s5 = scalar_lea.sflag [#allocation8], %s312_s17 }
  0x64   : > { %s1460_s19 = scalar_lea.vmem [#allocation7], %s774_s18 }
  0x65   : > { %1155 = dma.done.wait (%p1387_p1), %s313_s5, 2048  }
  0x66   : > { %1157 = vsyncadd (%p1387_p1), %s313_s5, 4294965248  ;;  %s776_s14 = sshll.u32 %s1448_s11, 3  ;;  %p367_p4 = scmp.lt.s32.totalorder %s1188_s29, 3 }
  0x67   : > { %s1605_s22 = sld [smem:[#allocation23_spill]]  ;;  %s1475_s28 = scalar_lea.vmem [#allocation9], %s774_s18 }
  0x68   : > { %s1469_s10 = scalar_select %p367_p4, %s1188_s29, 3 }
  0x69   : > { %s1477_s16 = scalar_lea.vmem [#allocation10], %s776_s14  ;;  %p777_p3 = scmp.ne.s32.totalorder %s1188_s29, 0 }
  0x6a   : > { %s1606_s7 = sld [smem:[#allocation24_spill]] (!%p777_p3) }
  0x6b   : > { %375 = sbr.rel (%p777_p3) target bundleno = 114 (0x72), region = 60 }
  0x6d   : > { %s369_s23 = scalar_lea.vmem %s1605_s22, %s1469_s10 }
  0x70   : > { %v778_v0 = vld [vmem:[%s1606_s7] ss:$0 sm:$0xff] }
  0x71   : > { %383 = vst [vmem:[#allocation2] sm:$0xff] %v778_v0 }
  0x72 PF: > { %v980_v1 = vld [vmem:[%s1460_s19 + $0x38] sm:$0xff]   ;;  %v1212_v2 = vmov 0.0   ;;  %v981_v3 = vld [vmem:[%s1460_s19 + $0x30] sm:$0xff]   ;;  %vm1213_vm0 = vmmov 0   ;;  %v982_v4 = vld [vmem:[%s1460_s19 + $0x28] sm:$0xff]   ;;  %s496_s13 = sld [smem:[#allocation3]] }
  0x73   : > { %823 = vmatprep.subr.bf16.mxu0 %v1212_v2  ;;  %843 = vmatprep.subr.bf16.mxu1 %v1212_v2  ;;  %v988_v5 = vld [vmem:[%s1475_s28 + $0x38] sm:$0xff]   ;;  %v983_v6 = vld [vmem:[%s1460_s19 + $0x20] sm:$0xff]   ;;  %v989_v7 = vld [vmem:[%s1475_s28 + $0x30] sm:$0xff]   ;;  %p799_p13 = scmp.ne.s32.totalorder %s1188_s29, 3 }
  0x74   : > { %824 = vmatpush3.bf16.msra.mxu0 %v980_v1  ;;  %839 = vmatprep.mubr.msk.bf16.mxu0 %vm1213_vm0, %v1212_v2  ;;  %v984_v8 = vld [vmem:[%s1460_s19 + $0x18] sm:$0xff]   ;;  %v990_v9 = vld [vmem:[%s1475_s28 + $0x28] sm:$0xff]   ;;  %v985_v10 = vld [vmem:[%s1460_s19 + $0x10] sm:$0xff]  }
  0x75   : > { %825 = vmatprep.subr.bf16.mxu0 %v1212_v2  ;;  %859 = vmatprep.mubr.msk.bf16.mxu1 %vm1213_vm0, %v1212_v2  ;;  %v991_v11 = vld [vmem:[%s1475_s28 + $0x20] sm:$0xff]   ;;  %v986_v12 = vld [vmem:[%s1460_s19 + $0x8] sm:$0xff]   ;;  %v992_v13 = vld [vmem:[%s1475_s28 + $0x18] sm:$0xff]  }
  0x76   : > { %844 = vmatpush3.bf16.msra.mxu1 %v988_v5  ;;  %v987_v14 = vld [vmem:[%s1460_s19] sm:$0xff]   ;;  %v993_v15 = vld [vmem:[%s1475_s28 + $0x10] sm:$0xff]   ;;  %v384_v16 = vld [vmem:[%s1452_s4] sm:$0xf] }
  0x77   : > { %845 = vmatprep.subr.bf16.mxu1 %v1212_v2  ;;  %v994_v17 = vld [vmem:[%s1475_s28 + $0x8] sm:$0xff]   ;;  %v995_v18 = vld [vmem:[%s1475_s28] sm:$0xff]   ;;  %v779_v19 = vld [vmem:[%s369_s23] ss:$0 sm:$0xff] }
  0x78   : > { %826 = vmatpush3.bf16.msra.mxu0 %v981_v3  ;;  %v497_v21 = vstv %s496_s13  ;;  %v500_v27 = vld [vmem:[#allocation2] sm:$0xff] }
  0x79   : > { %827 = vmatprep.subr.bf16.mxu0 %v1212_v2 }
  0x7a   : > { %846 = vmatpush3.bf16.msra.mxu1 %v989_v7 }
  0x7b   : > { %847 = vmatprep.subr.bf16.mxu1 %v1212_v2 }
  0x7c   : > { %828 = vmatpush3.bf16.msra.mxu0 %v982_v4 }
  0x7d   : > { %829 = vmatprep.subr.bf16.mxu0 %v1212_v2 }
  0x7e   : > { %848 = vmatpush3.bf16.msra.mxu1 %v990_v9 }
  0x7f   : > { %849 = vmatprep.subr.bf16.mxu1 %v1212_v2 }
  0x80   : > { %830 = vmatpush3.bf16.msra.mxu0 %v983_v6 }
  0x81   : > { %831 = vmatprep.subr.bf16.mxu0 %v1212_v2 }
  0x82   : > { %850 = vmatpush3.bf16.msra.mxu1 %v991_v11 }
  0x83   : > { %851 = vmatprep.subr.bf16.mxu1 %v1212_v2 }
  0x84   : > { %832 = vmatpush3.bf16.msra.mxu0 %v984_v8 }
  0x85   : > { %833 = vmatprep.subr.bf16.mxu0 %v1212_v2 }
  0x86   : > { %852 = vmatpush3.bf16.msra.mxu1 %v992_v13 }
  0x87   : > { %853 = vmatprep.subr.bf16.mxu1 %v1212_v2 }
  0x88   : > { %834 = vmatpush3.bf16.msra.mxu0 %v985_v10 }
  0x89   : > { %835 = vmatprep.subr.bf16.mxu0 %v1212_v2 }
  0x8a   : > { %854 = vmatpush3.bf16.msra.mxu1 %v993_v15 }
  0x8b   : > { %855 = vmatprep.subr.bf16.mxu1 %v1212_v2 }
  0x8c   : > { %836 = vmatpush3.bf16.msra.mxu0 %v986_v12 }
  0x8d   : > { %837 = vmatprep.subr.bf16.mxu0 %v1212_v2 }
  0x8e   : > { %856 = vmatpush3.bf16.msra.mxu1 %v994_v17 }
  0x8f   : > { %857 = vmatprep.subr.bf16.mxu1 %v1212_v2 }
  0x90   : > { %838 = vmatpush3.bf16.msra.mxu0 %v987_v14 }
  0x92   : > { %858 = vmatpush3.bf16.msra.mxu1 %v995_v18 }
  0x93   : > { %840 = vmatmul.mubr.bf16.vlgmr.msra.gmra.mxu0 %v384_v16 }
 0x153   : > { %v490_v20 = vpop.f32.mrf.mxu0 }
 0x154   : > { %v491_v22 = vadd.f32 %v779_v19, %v490_v20 }
 0x155   : > { %v841_v23 = vpop.f32.mrf.mxu0 }
 0x156   : > { %vm498_vm1 = vcmp.gt.f32.partialorder %v491_v22, %v497_v21  ;;  %v797_v24 = vpack.c.bf16 %v491_v22, %v491_v22 }
 0x157   : > { %vm796_vm2 = vmpackc.low %vm498_vm1, %vm498_vm1  ;;  %v493_v25 = vpop.f32.mrf.mxu0 }
 0x158   : > { %860 = vmatmul.mubr.msk.bf16.vlgmr.msra.gmra.mxu1 %vm796_vm2, %v797_v24 }
 0x159   : > { %v842_v26 = vpop.f32.mrf.mxu0 }
 0x218   : > { %v600_v28 = vpop.f32.mrf.mxu1 }
 0x219   : > { %v606_v29 = vadd.f32 %v600_v28, %v500_v27 }
 0x21a   : > { %v861_v30 = vpop.f32.mrf.mxu1  ;;  %611 = sbr.rel (%p799_p13) target bundleno = 548 (0x224), region = 64 }
 0x21b   : > { %607 = vst [vmem:[#allocation2] sm:$0xff] %v606_v29 }
 0x21c   : > { %v603_v31 = vpop.f32.mrf.mxu1 }
 0x21e   : > { %v862_v32 = vpop.f32.mrf.mxu1 }
 0x222   : > { %v612_v33 = vld [vmem:[#allocation2] sm:$0xff] }
 0x223   : > { %613 = vst [vmem:[%s1477_s16] sm:$0xff] %v612_v33 }
 0x224 PF: > { %s1608_s4 = sld [smem:[#allocation15_spill]]  ;;  %s628_s10 = sshll.u32 %s1477_s16, 4  ;;  %s629_s10 = int_to_ptr.vmem [resolvable:$true] %s628_s10 }
 0x225   : > { %s1609_s19 = sld [smem:[#allocation25_spill]]  ;;  %s615_s15 = scalar_lea.sflag [#allocation6], %s1448_s11 }
 0x226   : > { %s1080_s21 = scalar_lea.vmem %s629_s10, 128  ;;  %s1214_s29 = smov [#allocation10]  }
 0x227   : > { %p1081_p1 = scmp.ne.s32.totalorder %s629_s10, %s1080_s21  ;;  %s1084_s22 = sshll.u32 %s1214_s29, 4  ;;  %s1085_s22 = int_to_ptr.vmem [resolvable:$false] %s1084_s22 }
 0x228   : > { %s1086_s23 = scalar_lea.vmem %s1085_s22, 256  ;;  %p1087_p5 = scmp.lt.s32.totalorder %s629_s10, %s1085_s22 }
 0x229   : > { %p1082_p12 = pnand %p1081_p1, %p1403_p10  ;;  %p1088_p7 = scmp.lt.s32.totalorder %s1086_s23, %s1080_s21 }
 0x22a   : > { %s801_s20 = sshll.u32 %s1608_s4, 7 }
 0x22b   : > { %s626_s14 = scalar_lea.hbm %s1609_s19, %s801_s20  ;;  %p1083_p2 = pneg %p1082_p12 }
 0x22c   : > { %p1089_p11 = por %p1088_p7, %p1087_p5 }
 0x22e   : > { %p1090_p9 = pnand %p1089_p11, %p1083_p2 }
 0x230   : > { %1093 = shalt.err (!%p1090_p9)
}
 0x231   : > { %s1094_s28 = scalar_lea.hbm %s626_s14, 128  ;;  %s1098_s9 = scalar_lea.hbm %s1609_s19, 256 }
 0x232   : > { %p1095_p0 = scmp.ne.s32.totalorder %s626_s14, %s1094_s28  ;;  %p1099_p4 = scmp.lt.s32.totalorder %s626_s14, %s1609_s19 }
 0x233   : > { %p1100_p3 = scmp.lt.s32.totalorder %s1098_s9, %s1094_s28 }
 0x234   : > { %p1096_p6 = pnand %p1095_p0, %p1403_p10 }
 0x235   : > { %p1101_p13 = por %p1100_p3, %p1099_p4 }
 0x236   : > { %p1097_p8 = pneg %p1096_p6 }
 0x238   : > { %p1102_p1 = pnand %p1101_p13, %p1097_p8 }
 0x23a   : > { %1105 = shalt.err (!%p1102_p1)
}
 0x23b   : > { %869 = dma.vmem_to_hbm [thread:$0]  (%p1403_p10), %s629_s10, 128, %s626_s14, %s615_s15  }
 0x23c PF: > { %p886_p12 = scmp.ge.s32.totalorder %s1204_s8, 2  ;;  %s640_s13 = sand.u32 1, %s1176_s26  }
 0x23d   : > { %p1610_p2 = scmp.ne.s32.totalorder %s1598_s12, 0  ;;  %s641_s0 = scalar_lea.sflag [#allocation6], %s640_s13 }
 0x23f   : > { %p882_p5 = pnand %p886_p12, %p1610_p2 }
 0x241   : > { %p883_p7 = pneg %p882_p5 }
 0x243   : > { %1159 = dma.done.wait (%p883_p7), %s641_s0, 128  }
 0x244   : > { %1161 = vsyncadd (%p883_p7), %s641_s0, 4294967168  ;;  %s26_s8 = sadd.s32 1, %s1204_s8   ;;  %s1611_s1 = sld [smem:[#allocation19_spill]] }
 0x245   : > { %p23_p11 = scmp.ge.s32.totalorder %s26_s8, 10   ;;  %s1612_s6 = sld [smem:[#allocation14_spill]] }
 0x246   : > { %s1613_s28 = sld [smem:[#allocation20_spill]]  ;;  %s1617_s23 = smov %s1168_s24 }
 0x247   : > { %s1614_s5 = sld [smem:[#allocation16_spill]]  ;;  %s1618_s24 = smov %s1172_s25 }
 0x248   : > { %s1615_s17 = sld [smem:[#allocation17_spill]]  ;;  %s1620_s26 = smov %s1180_s27 }
 0x249   : > { %s1616_s7 = sld [smem:[#allocation18_spill]]  ;;  %s1622_s29 = smov %s1196_s30 }
 0x24a   : > { %s1619_s25 = smov %s1611_s1  ;;  %25 = sbr.rel (!%p23_p11) target bundleno = 18 (0x12), region = 124 }
 0x24b   : > { %s1621_s27 = smov %s1612_s6 }
 0x24e   : > { %s1623_s30 = smov %s1615_s17 }
 0x24f   :  { %646 = vsyncpa [#allocation5], 1 }
 0x250   :  { %648 = vsyncpa [#allocation5 + $0x1], 1 }
 0x251   :  { %649 = vsyncpa [#allocation8], 1 }
 0x252   :  { %651 = vsyncpa [#allocation8 + $0x1], 1 }
 0x253   :  { %652 = vsyncpa [#allocation6], 1 }
 0x254   :  { %654 = vsyncpa [#allocation6 + $0x1], 1 }

</bundles_post_ra>
